<compile_context>
chip_gen: v6e
topology: v6e:2x2x1
jax: 0.10.0
libtpu: 0.0.40
codegen_flags: <defaults>
</compile_context>

<pallas_src>
import functools

import numpy as np

import jax
import jax.numpy as jnp
from jax.experimental import pallas as pl
from jax.experimental.pallas import tpu as pltpu


# --------------------------------------------------------------------------
# Exact GELU via Abramowitz–Stegun 7.1.26 erf (max err ~1.5e-7).  Uses only
# add/mul/div/exp/where, which all lower cleanly on the TPU VPU/EUP.
# --------------------------------------------------------------------------
_SQRT_HALF = 0.7071067811865476


def _erf_poly(z):
    a1, a2, a3, a4, a5 = (0.254829592, -0.284496736, 1.421413741,
                          -1.453152027, 1.061405429)
    p = 0.3275911
    sgn = jnp.where(z < 0.0, -1.0, 1.0)
    az = jnp.abs(z)
    t = 1.0 / (1.0 + p * az)
    poly = ((((a5 * t + a4) * t + a3) * t + a2) * t + a1) * t
    return sgn * (1.0 - poly * jnp.exp(-az * az))


def _gelu_exact(x):
    # Matches PyTorch nn.GELU() default (erf form), computed in f32.
    return 0.5 * x * (1.0 + _erf_poly(x * _SQRT_HALF))


# --------------------------------------------------------------------------
# Fused kernel: per (batch, window) -> token MLP + GELU + patch-conv reduce.
# --------------------------------------------------------------------------
def _rec_trac_head2_kernel(x_ref, wm_ref, bm_ref, wc_ref, bct_ref, o_ref):
    # x_ref  : (1, PP, C)  bf16   tokens of this conv window (channels-last)
    # wm_ref : (C, C)      bf16   MLP weight, already (in, out) layout
    # bm_ref : (1, C)      f32    MLP bias
    # wc_ref : (2, PP, C)  f32    conv weight, re-laid out as (out, i*P+j, c)
    # bct_ref: (1, 8, 128) f32    conv bias baked into an output-shaped tile
    # o_ref  : (1, 8, 128) f32    lane-dense output tile (lanes 0/1 are real)
    tokens = x_ref[0]                                        # (PP, C)
    acc = jnp.dot(tokens, wm_ref[...],
                  preferred_element_type=jnp.float32)        # MXU, f32 acc
    acc = acc + bm_ref[...].astype(jnp.float32)
    g = _gelu_exact(acc)                                     # (PP, C) f32

    # kernel==stride conv on the window == full contraction over (p, c).
    s0 = jnp.sum(g * wc_ref[0])                              # scalar
    s1 = jnp.sum(g * wc_ref[1])                              # scalar

    lane = jax.lax.broadcasted_iota(jnp.int32, o_ref.shape, 2)
    vals = jnp.where(lane == 0, s0, jnp.where(lane == 1, s1, 0.0))
    o_ref[...] = (vals + bct_ref[...]).astype(o_ref.dtype)


# --------------------------------------------------------------------------
# RecTracHead2 forward
# --------------------------------------------------------------------------
@functools.partial(jax.jit, static_argnames=("patch_size", "compute_dtype"))
def rec_trac_head2_forward(x, w_mlp, b_mlp, w_conv, b_conv, *, patch_size=8,
                           compute_dtype=jnp.bfloat16):
    """x: (B, in_dim, 169, 1); PyTorch-layout params.  Returns (B, 2, Gh, Gw)."""
    B, C, S, T = x.shape
    P = patch_size
    G = 13                                  # fixed by the module's unflatten
    assert S == G * G
    assert w_mlp.shape == (C, C) and b_mlp.shape == (C,)
    assert w_conv.shape == (2, C, P, P) and b_conv.shape == (2,)
    # TODO(synk): the original forward calls `self.conv()` with NO argument (a
    # bug in the tryout code); we apply the conv to the MLP output — the
    # evident intent — squeezing the trailing singleton time dim to get NCHW.
    assert T == 1

    Gh = (G - P) // P + 1
    Gw = Gh
    nW = Gh * Gw
    PP = P * P
    Bn = B * nW

    # Static token indices of every valid conv window (row-major within window).
    idx = np.array([[(gi * P + i) * G + (gj * P + j)
                     for i in range(P) for j in range(P)]
                    for gi in range(Gh) for gj in range(Gw)],
                   dtype=np.int32).reshape(-1)              # (nW*PP,)

    # x.transpose(1,3) + squeeze T: channels-last tokens, then gather windows.
    xt = jnp.transpose(x[..., 0], (0, 2, 1))                # (B, S, C)
    xw = jnp.take(xt, jnp.asarray(idx), axis=1)             # (B, nW*PP, C)
    xw = xw.reshape(Bn, PP, C).astype(compute_dtype)

    wm = jnp.transpose(w_mlp).astype(compute_dtype)         # (C, C) in->out
    bm = b_mlp.reshape(1, C).astype(jnp.float32)
    wc = jnp.transpose(w_conv, (0, 2, 3, 1)).reshape(2, PP, C).astype(jnp.float32)
    bct = jnp.zeros((1, 8, 128), jnp.float32)
    bct = bct.at[0, :, 0].set(b_conv[0]).at[0, :, 1].set(b_conv[1])

    cost = pl.CostEstimate(
        flops=2 * Bn * PP * C * C + 4 * Bn * PP * C,
        transcendentals=Bn * PP * C,
        bytes_accessed=(xw.size * 2 + wm.size * 2 + bm.size * 4
                        + wc.size * 4 + bct.size * 4 + Bn * 8 * 128 * 4),
    )

    out = pl.pallas_call(
        _rec_trac_head2_kernel,
        out_shape=jax.ShapeDtypeStruct((Bn, 8, 128), jnp.float32),
        grid=(Bn,),
        in_specs=[
            pl.BlockSpec((1, PP, C), lambda r: (r, 0, 0)),   # tokens of window r
            pl.BlockSpec((C, C), lambda r: (0, 0)),          # MLP weight
            pl.BlockSpec((1, C), lambda r: (0, 0)),          # MLP bias
            pl.BlockSpec((2, PP, C), lambda r: (0, 0, 0)),   # conv weight
            pl.BlockSpec((1, 8, 128), lambda r: (0, 0, 0)),  # conv bias tile
        ],
        out_specs=pl.BlockSpec((1, 8, 128), lambda r: (r, 0, 0)),
        compiler_params=pltpu.CompilerParams(
            dimension_semantics=("parallel",)),
        cost_estimate=cost,
    )(xw, wm, bm, wc, bct)

    rec = out[:, 0, :2]                                     # (Bn, 2)
    return rec.reshape(B, Gh, Gw, 2).transpose(0, 3, 1, 2)  # (B, 2, Gh, Gw)


# --------------------------------------------------------------------------
# Pure-JAX reference (matches the PyTorch module, exact GELU, real conv).
# --------------------------------------------------------------------------
def reference_forward(x, w_mlp, b_mlp, w_conv, b_conv, *, patch_size=8):
    B, C, S, T = x.shape
    h = jnp.transpose(x, (0, 3, 2, 1))
    h = h @ w_mlp.T + b_mlp
    h = 0.5 * h * (1.0 + jax.scipy.special.erf(h * _SQRT_HALF))
    h = jnp.transpose(h, (0, 3, 2, 1)).reshape(B, C, 13, 13, T)[..., 0]
    y = jax.lax.conv_general_dilated(
        h, w_conv, window_strides=(patch_size, patch_size), padding="VALID",
        dimension_numbers=("NCHW", "OIHW", "NCHW"))
    return y + b_conv.reshape(1, -1, 1, 1)


if __name__ == "__main__":
    # Small shapes implied by the module: in_dim=32, 13*13 tokens, batch=2.
    B, IN_DIM, S, T, P = 2, 32, 13 * 13, 1, 8

    key = jax.random.PRNGKey(0)
    kx, kw1, kb1, kw2, kb2 = jax.random.split(key, 5)
    x = jax.random.normal(kx, (B, IN_DIM, S, T), dtype=jnp.float32)
    w_mlp = jax.random.normal(kw1, (IN_DIM, IN_DIM), dtype=jnp.float32) * 0.02
    b_mlp = jax.random.normal(kb1, (IN_DIM,), dtype=jnp.float32) * 0.02
    w_conv = jax.random.normal(kw2, (2, IN_DIM, P, P), dtype=jnp.float32) * 0.02
    b_conv = jax.random.normal(kb2, (2,), dtype=jnp.float32) * 0.02

    out = rec_trac_head2_forward(x, w_mlp, b_mlp, w_conv, b_conv, patch_size=P)
    out = jax.block_until_ready(out)

    ref = reference_forward(x, w_mlp, b_mlp, w_conv, b_conv, patch_size=P)
    assert out.shape == (B, 2, 1, 1), out.shape
    max_err = float(jnp.max(jnp.abs(out - ref)))
    # bf16 MXU operands + f32 accumulation: loosened tolerance.
    assert jnp.allclose(out, ref, atol=2e-2, rtol=2e-2), max_err
    print("KERNEL_OK")
</pallas_src>

<mosaic_0001>
module attributes {stable_mosaic.version = 11 : i64} {
  func.func @_rec_trac_head2_kernel(%arg0: i32, %arg1: memref<1x64x32xbf16, #tpu.memory_space<vmem>>, %arg2: memref<32x32xbf16, #tpu.memory_space<vmem>>, %arg3: memref<1x32xf32, #tpu.memory_space<vmem>>, %arg4: memref<2x64x32xf32, #tpu.memory_space<vmem>>, %arg5: memref<1x8x128xf32, #tpu.memory_space<vmem>>, %arg6: memref<1x8x128xf32, #tpu.memory_space<vmem>>) attributes {dimension_semantics = [#tpu.dimension_semantics<parallel>], iteration_bounds = array<i64: 2>, scalar_prefetch = 0 : i64, scratch_operands = 0 : i64, tpu.core_type = #tpu.core_type<tc>, window_params = [{transform_indices = @transform_0, window_bounds = array<i64: 1, 64, 32>}, {pipeline_mode = #tpu.pipeline_mode<synchronous>, transform_indices = @transform_1, window_bounds = array<i64: 32, 32>}, {pipeline_mode = #tpu.pipeline_mode<synchronous>, transform_indices = @transform_2, window_bounds = array<i64: 1, 32>}, {pipeline_mode = #tpu.pipeline_mode<synchronous>, transform_indices = @transform_3, window_bounds = array<i64: 2, 64, 32>}, {pipeline_mode = #tpu.pipeline_mode<synchronous>, transform_indices = @transform_4, window_bounds = array<i64: 1, 8, 128>}, {transform_indices = @transform_5, window_bounds = array<i64: 1, 8, 128>}]} {
    %c0 = arith.constant 0 : index
    %c0_0 = arith.constant 0 : index
    %c0_1 = arith.constant 0 : index
    %0 = vector.load %arg1[%c0, %c0_0, %c0_1] : memref<1x64x32xbf16, #tpu.memory_space<vmem>>, vector<1x64x32xbf16>
    %1 = vector.shape_cast %0 : vector<1x64x32xbf16> to vector<64x32xbf16>
    %c0_2 = arith.constant 0 : index
    %c0_3 = arith.constant 0 : index
    %2 = vector.load %arg2[%c0_2, %c0_3] : memref<32x32xbf16, #tpu.memory_space<vmem>>, vector<32x32xbf16>
    %cst = arith.constant dense<0.000000e+00> : vector<64x32xf32>
    %3 = tpu.matmul %1, %2, %cst {dimension_numbers = #tpu.dot_dimension_numbers<[1], [0], [0], [1], [0, 0, 1, 1], [], []>} : vector<64x32xbf16>, vector<32x32xbf16>, vector<64x32xf32> -> vector<64x32xf32>
    %c0_4 = arith.constant 0 : index
    %c0_5 = arith.constant 0 : index
    %4 = vector.load %arg3[%c0_4, %c0_5] : memref<1x32xf32, #tpu.memory_space<vmem>>, vector<1x32xf32>
    %5 = vector.broadcast %4 : vector<1x32xf32> to vector<64x32xf32>
    %6 = arith.addf %3, %5 : vector<64x32xf32>
    %cst_6 = arith.constant 5.000000e-01 : f32
    %7 = vector.broadcast %cst_6 : f32 to vector<64x32xf32>
    %8 = arith.mulf %7, %6 : vector<64x32xf32>
    %cst_7 = arith.constant 0.707106769 : f32
    %9 = vector.broadcast %cst_7 : f32 to vector<64x32xf32>
    %10 = arith.mulf %6, %9 : vector<64x32xf32>
    %cst_8 = arith.constant 0.000000e+00 : f32
    %11 = vector.broadcast %cst_8 : f32 to vector<64x32xf32>
    %12 = arith.cmpf olt, %10, %11 : vector<64x32xf32>
    %cst_9 = arith.constant -1.000000e+00 : f32
    %cst_10 = arith.constant 1.000000e+00 : f32
    %13 = vector.broadcast %cst_9 : f32 to vector<64x32xf32>
    %14 = vector.broadcast %cst_10 : f32 to vector<64x32xf32>
    %15 = arith.select %12, %13, %14 : vector<64x32xi1>, vector<64x32xf32>
    %16 = math.absf %10 : vector<64x32xf32>
    %cst_11 = arith.constant 0.327591091 : f32
    %17 = vector.broadcast %cst_11 : f32 to vector<64x32xf32>
    %18 = arith.mulf %17, %16 : vector<64x32xf32>
    %cst_12 = arith.constant 1.000000e+00 : f32
    %19 = vector.broadcast %cst_12 : f32 to vector<64x32xf32>
    %20 = arith.addf %19, %18 : vector<64x32xf32>
    %cst_13 = arith.constant 1.000000e+00 : f32
    %21 = vector.broadcast %cst_13 : f32 to vector<64x32xf32>
    %22 = arith.divf %21, %20 : vector<64x32xf32>
    %cst_14 = arith.constant 1.06140542 : f32
    %23 = vector.broadcast %cst_14 : f32 to vector<64x32xf32>
    %24 = arith.mulf %23, %22 : vector<64x32xf32>
    %cst_15 = arith.constant -1.45315206 : f32
    %25 = vector.broadcast %cst_15 : f32 to vector<64x32xf32>
    %26 = arith.addf %24, %25 : vector<64x32xf32>
    %27 = arith.mulf %26, %22 : vector<64x32xf32>
    %cst_16 = arith.constant 1.42141378 : f32
    %28 = vector.broadcast %cst_16 : f32 to vector<64x32xf32>
    %29 = arith.addf %27, %28 : vector<64x32xf32>
    %30 = arith.mulf %29, %22 : vector<64x32xf32>
    %cst_17 = arith.constant -0.284496725 : f32
    %31 = vector.broadcast %cst_17 : f32 to vector<64x32xf32>
    %32 = arith.addf %30, %31 : vector<64x32xf32>
    %33 = arith.mulf %32, %22 : vector<64x32xf32>
    %cst_18 = arith.constant 0.254829586 : f32
    %34 = vector.broadcast %cst_18 : f32 to vector<64x32xf32>
    %35 = arith.addf %33, %34 : vector<64x32xf32>
    %36 = arith.mulf %35, %22 : vector<64x32xf32>
    %cst_19 = arith.constant 0.000000e+00 : f32
    %37 = vector.broadcast %cst_19 : f32 to vector<64x32xf32>
    %38 = arith.subf %37, %16 : vector<64x32xf32>
    %39 = arith.mulf %38, %16 : vector<64x32xf32>
    %40 = math.exp %39 : vector<64x32xf32>
    %41 = arith.mulf %36, %40 : vector<64x32xf32>
    %cst_20 = arith.constant 1.000000e+00 : f32
    %42 = vector.broadcast %cst_20 : f32 to vector<64x32xf32>
    %43 = arith.subf %42, %41 : vector<64x32xf32>
    %44 = arith.mulf %15, %43 : vector<64x32xf32>
    %cst_21 = arith.constant 1.000000e+00 : f32
    %45 = vector.broadcast %cst_21 : f32 to vector<64x32xf32>
    %46 = arith.addf %45, %44 : vector<64x32xf32>
    %47 = arith.mulf %8, %46 : vector<64x32xf32>
    %c0_22 = arith.constant 0 : index
    %c0_23 = arith.constant 0 : index
    %c0_24 = arith.constant 0 : index
    %48 = vector.load %arg4[%c0_22, %c0_23, %c0_24] : memref<2x64x32xf32, #tpu.memory_space<vmem>>, vector<1x64x32xf32>
    %49 = vector.shape_cast %48 : vector<1x64x32xf32> to vector<64x32xf32>
    %50 = arith.mulf %47, %49 : vector<64x32xf32>
    %51 = vector.shape_cast %50 : vector<64x32xf32> to vector<1x64x32xf32>
    %cst_25 = arith.constant dense<0.000000e+00> : vector<1xf32>
    %52 = vector.multi_reduction <add>, %51, %cst_25 [1, 2] : vector<1x64x32xf32> to vector<1xf32>
    %53 = vector.shape_cast %52 : vector<1xf32> to vector<1x1x1xf32>
    %54 = vector.extract %53[0, 0, 0] : f32 from vector<1x1x1xf32>
    %c1 = arith.constant 1 : index
    %c0_26 = arith.constant 0 : index
    %c0_27 = arith.constant 0 : index
    %55 = vector.load %arg4[%c1, %c0_26, %c0_27] : memref<2x64x32xf32, #tpu.memory_space<vmem>>, vector<1x64x32xf32>
    %56 = vector.shape_cast %55 : vector<1x64x32xf32> to vector<64x32xf32>
    %57 = arith.mulf %47, %56 : vector<64x32xf32>
    %58 = vector.shape_cast %57 : vector<64x32xf32> to vector<1x64x32xf32>
    %cst_28 = arith.constant dense<0.000000e+00> : vector<1xf32>
    %59 = vector.multi_reduction <add>, %58, %cst_28 [1, 2] : vector<1x64x32xf32> to vector<1xf32>
    %60 = vector.shape_cast %59 : vector<1xf32> to vector<1x1x1xf32>
    %61 = vector.extract %60[0, 0, 0] : f32 from vector<1x1x1xf32>
    %62 = tpu.iota {dimensions = array<i32: 2>} : vector<1x8x128xi32>
    %c0_i32 = arith.constant 0 : i32
    %63 = vector.broadcast %c0_i32 : i32 to vector<1x8x128xi32>
    %64 = arith.cmpi eq, %62, %63 : vector<1x8x128xi32>
    %c1_i32 = arith.constant 1 : i32
    %65 = vector.broadcast %c1_i32 : i32 to vector<1x8x128xi32>
    %66 = arith.cmpi eq, %62, %65 : vector<1x8x128xi32>
    %cst_29 = arith.constant 0.000000e+00 : f32
    %67 = vector.broadcast %61 : f32 to vector<1x8x128xf32>
    %68 = vector.broadcast %cst_29 : f32 to vector<1x8x128xf32>
    %69 = arith.select %66, %67, %68 : vector<1x8x128xi1>, vector<1x8x128xf32>
    %70 = vector.broadcast %54 : f32 to vector<1x8x128xf32>
    %71 = arith.select %64, %70, %69 : vector<1x8x128xi1>, vector<1x8x128xf32>
    %c0_30 = arith.constant 0 : index
    %c0_31 = arith.constant 0 : index
    %c0_32 = arith.constant 0 : index
    %72 = vector.load %arg5[%c0_30, %c0_31, %c0_32] : memref<1x8x128xf32, #tpu.memory_space<vmem>>, vector<1x8x128xf32>
    %73 = arith.addf %71, %72 : vector<1x8x128xf32>
    %c0_33 = arith.constant 0 : index
    %c0_34 = arith.constant 0 : index
    %c0_35 = arith.constant 0 : index
    %74 = vector.load %arg6[%c0_33, %c0_34, %c0_35] : memref<1x8x128xf32, #tpu.memory_space<vmem>>, vector<1x8x128xf32>
    tpu.vector_store %arg6[%c0_33, %c0_34, %c0_35], %73 {strides = array<i32>} : memref<1x8x128xf32, #tpu.memory_space<vmem>>, vector<1x8x128xf32>,
    return
  }
  func.func @transform_0(%arg0: i32) -> (i32, i32, i32) {
    %c0_i32 = arith.constant 0 : i32
    %c0_i32_0 = arith.constant 0 : i32
    %c0_i32_1 = arith.constant 0 : i32
    return %arg0, %c0_i32, %c0_i32_0 : i32, i32, i32
  }
  func.func @transform_1(%arg0: i32) -> (i32, i32) {
    %c0_i32 = arith.constant 0 : i32
    %c0_i32_0 = arith.constant 0 : i32
    %c0_i32_1 = arith.constant 0 : i32
    return %c0_i32, %c0_i32_0 : i32, i32
  }
  func.func @transform_2(%arg0: i32) -> (i32, i32) {
    %c0_i32 = arith.constant 0 : i32
    %c0_i32_0 = arith.constant 0 : i32
    %c0_i32_1 = arith.constant 0 : i32
    return %c0_i32, %c0_i32_0 : i32, i32
  }
  func.func @transform_3(%arg0: i32) -> (i32, i32, i32) {
    %c0_i32 = arith.constant 0 : i32
    %c0_i32_0 = arith.constant 0 : i32
    %c0_i32_1 = arith.constant 0 : i32
    %c0_i32_2 = arith.constant 0 : i32
    return %c0_i32, %c0_i32_0, %c0_i32_1 : i32, i32, i32
  }
  func.func @transform_4(%arg0: i32) -> (i32, i32, i32) {
    %c0_i32 = arith.constant 0 : i32
    %c0_i32_0 = arith.constant 0 : i32
    %c0_i32_1 = arith.constant 0 : i32
    %c0_i32_2 = arith.constant 0 : i32
    return %c0_i32, %c0_i32_0, %c0_i32_1 : i32, i32, i32
  }
  func.func @transform_5(%arg0: i32) -> (i32, i32, i32) {
    %c0_i32 = arith.constant 0 : i32
    %c0_i32_0 = arith.constant 0 : i32
    %c0_i32_1 = arith.constant 0 : i32
    return %arg0, %c0_i32, %c0_i32_0 : i32, i32, i32
  }
}

</mosaic_0001>

<bundles_post_ra>
// kernel: rec_trac_head2_forward.1
= control target key start
LH: loop header
LB: loop body
LE: loop exit
PB: predicated region body
PF: predicated region fallthrough
CT: control target
= control target key end

     0   :  { %s856_s18 = smov 0   ;;  %s1096_s0 = inlined_call_operand.vmem [shape: bf16[2,64,32], index: 0, kind: input, shape index: {}]   ;;  %s1097_s1 = inlined_call_operand.vmem [shape: bf16[32,32], index: 1, kind: input, shape index: {}]   ;;  %s1098_s2 = inlined_call_operand.vmem [shape: f32[1,32], index: 2, kind: input, shape index: {}]   ;;  %s1099_s3 = inlined_call_operand.vmem [shape: f32[2,64,32], index: 3, kind: input, shape index: {}]   ;;  %s1100_s4 = inlined_call_operand.vmem [shape: f32[1,8,128], index: 4, kind: input, shape index: {}]   ;;  %s1101_s5 = inlined_call_operand.vmem [shape: f32[2,8,128], index: 5, kind: output, shape index: {}]  }
   0x1 LB: > { %s714_s19 = sadd.s32 4294967295, %s823_s18   ;;  %p718_p0 = scmp.ge.s32.totalorder %s823_s18, 1  ;;  %s823_s18 = sphi %s856_s18, %s15_s18  }
   0x2   : > { %p187_p1 = scmp.lt.s32.totalorder %s823_s18, 3 }
   0x4   : > { %p188_p2 = pnand %p718_p0, %p187_p1 }
   0x5   : > { %p214_p3 = scmp.lt.s32.totalorder (!%p188_p2), %s714_s19, 1 }
   0x6   : > { %191 = sbr.rel (%p188_p2) target bundleno = 502 (0x1f6), region = 40 }
   0xb   : > { %v779_v0 = vld [vmem:[%s1097_s1 + $0x8] sm:$0xff]   ;;  %v780_v1 = vld [vmem:[%s1097_s1] sm:$0xff]   ;;  %s1103_s19 = smov (!%p214_p3, %s714_s19), 1  ;;  %vm275_vm0 = vcmask 261120  }
   0xc   : > { %750 = vmatprep.subr.bf16.mxu0 %v779_v0  ;;  %762 = vmatprep.subr.bf16.mxu1 %v779_v0  ;;  %s743_s24 = sshll.u32 %s1103_s19, 5  ;;  %v722_v6 = vld [vmem:[%s1098_s2] ss:$0 sm:$0xff]  ;;  %s721_s15 = sshll.u32 %s1103_s19, 3 }
   0xd   : > { %751 = vmatpush3.bf16.msra.mxu0 %v779_v0  ;;  %764 = vmatpush3.bf16.msra.mxu1 %v779_v0  ;;  %s218_s27 = scalar_lea.vmem %s1096_s0, %s743_s24  ;;  %s222_s23 = scalar_lea.vmem %s1101_s5, %s721_s15 }
   0xe   : > { %752 = vmatprep.subr.bf16.mxu0 %v780_v1  ;;  %763 = vmatprep.subr.bf16.mxu1 %v780_v1  ;;  %v781_v2 = vld [vmem:[%s218_s27] sm:$0xff]   ;;  %v782_v3 = vld [vmem:[%s218_s27 + $0x10] sm:$0xff]   ;;  %v783_v4 = vld [vmem:[%s218_s27 + $0x8] sm:$0xff]  }
   0xf   : > { %754 = vmatprep.mubr.msk.bf16.mxu0 %vm275_vm0, %v781_v2  ;;  %758 = vmatprep.mubr.msk.bf16.mxu1 %vm275_vm0, %v782_v3  ;;  %v784_v5 = vld [vmem:[%s218_s27 + $0x18] sm:$0xff]  }
  0x11   : > { %753 = vmatpush3.bf16.msra.mxu0 %v780_v1  ;;  %765 = vmatpush3.bf16.msra.mxu1 %v780_v1 }
  0x14   : > { %755 = vmatmul.mubr.msk.bf16.vlgmr.msra.gmra.mxu0 %vm275_vm0, %v783_v4  ;;  %759 = vmatmul.mubr.msk.bf16.vlgmr.msra.gmra.mxu1 %vm275_vm0, %v784_v5 }
  0xd4   : > { %v756_v7 = vpop.f32.mrf.mxu0  ;;  %v760_v9 = vpop.f32.mrf.mxu1 }
  0xd5   : > { %v883_v8 = vadd.f32 %v756_v7, %v722_v6  ;;  %v885_v10 = vadd.f32 %v760_v9, %v722_v6 }
  0xd6   : > { %v322_v11 = vpop.f32.mrf.mxu0  ;;  %v338_v14 = vpop.f32.mrf.mxu1 }
  0xd7   : > { %v888_v12 = vmul.f32 0.70710677, %v883_v8  ;;  %v890_v13 = vadd.f32 %v722_v6, %v322_v11  ;;  %v893_v15 = vmul.f32 0.70710677, %v885_v10  ;;  %v899_v18 = vadd.f32 %v722_v6, %v338_v14 }
  0xd8   : > { %v757_v21 = vpop.f32.mrf.mxu0  ;;  %v761_v31 = vpop.f32.mrf.mxu1 }
  0xd9   : > { %v387_v16 = vand.u32 2147483647, %v888_v12  ;;  %v897_v17 = vmul.f32 0.70710677, %v890_v13  ;;  %v391_v19 = vand.u32 2147483647, %v893_v15  ;;  %v906_v28 = vadd.f32 %v757_v21, %v722_v6 }
  0xda   : > { %v904_v25 = vmul.f32 0.70710677, %v899_v18  ;;  %v325_v33 = vpop.f32.mrf.mxu0  ;;  %v912_v36 = vadd.f32 %v761_v31, %v722_v6  ;;  %v341_v39 = vpop.f32.mrf.mxu1  ;;  %vm371_vm2 = vcmp.lt.f32.partialorder %v888_v12, 0.0  ;;  %vm375_vm5 = vcmp.lt.f32.partialorder %v893_v15, 0.0 }
  0xdb   : > { %v395_v20 = vmul.f32 0.3275911, %v387_v16  ;;  %v399_v22 = vmul.f32 0.3275911, %v391_v19  ;;  %v385_v23 = vand.u32 2147483647, %v897_v17  ;;  %v915_v38 = vadd.f32 %v722_v6, %v325_v33 }
  0xdc   : > { %v389_v29 = vand.u32 2147483647, %v904_v25  ;;  %v910_v34 = vmul.f32 0.70710677, %v906_v28  ;;  %v918_v41 = vmul.f32 0.70710677, %v912_v36  ;;  %v923_v44 = vadd.f32 %v722_v6, %v341_v39 }
  0xdd   : > { %v403_v24 = vadd.f32 1.0, %v395_v20  ;;  %v407_v26 = vadd.f32 1.0, %v399_v22  ;;  %v393_v27 = vmul.f32 0.3275911, %v385_v23  ;;  %v499_v42 = vsub.f32 0.0, %v387_v16 }
  0xde   : > { %v397_v32 = vmul.f32 0.3275911, %v389_v29  ;;  %v388_v37 = vand.u32 2147483647, %v910_v34  ;;  %v921_v43 = vmul.f32 0.70710677, %v915_v38 }
  0xdf   : > { %785 = vrcp.f32 %v403_v24  ;;  %v401_v30 = vadd.f32 1.0, %v393_v27  ;;  %v392_v46 = vand.u32 2147483647, %v918_v41  ;;  %v503_v47 = vsub.f32 0.0, %v391_v19 }
  0xe0   : > { %787 = vrcp.f32 %v407_v26  ;;  %v405_v35 = vadd.f32 1.0, %v397_v32  ;;  %v396_v40 = vmul.f32 0.3275911, %v388_v37  ;;  %v497_v48 = vsub.f32 0.0, %v385_v23 }
  0xe1   : > { %789 = vrcp.f32 %v401_v30  ;;  %v386_v49 = vand.u32 2147483647, %v921_v43  ;;  %v400_v50 = vmul.f32 0.3275911, %v392_v46  ;;  %v507_v51 = vmul.f32 %v499_v42, %v387_v16 }
  0xe2   : > { %791 = vrcp.f32 %v405_v35  ;;  %v404_v45 = vadd.f32 1.0, %v396_v40  ;;  %v928_v53 = vmul.f32 0.70710677, %v923_v44  ;;  %v511_v58 = vmul.f32 %v503_v47, %v391_v19 }
  0xe3   : > { %v394_v52 = vmul.f32 0.3275911, %v386_v49  ;;  %v408_v55 = vadd.f32 1.0, %v400_v50  ;;  %v505_v59 = vmul.f32 %v497_v48, %v385_v23  ;;  %v501_v62 = vsub.f32 0.0, %v389_v29 }
  0xe4   : > { %793 = vrcp.f32 %v404_v45  ;;  %v500_v63 = vsub.f32 0.0, %v388_v37  ;;  %v517_v1 = vmul.f32 1.442695, %v507_v51  ;;  %v937_v2 = vand.u32 2147483647, %v928_v53 }
  0xe5   : > { %v402_v60 = vadd.f32 1.0, %v394_v52  ;;  %795 = vrcp.f32 %v408_v55  ;;  %v513_v7 = vmul.f32 1.442695, %v505_v59  ;;  %v525_v16 = vmul.f32 1.442695, %v511_v58 }
  0xe6   : > { %v398_v9 = vmul.f32 0.3275911, %v937_v2  ;;  %v509_v19 = vmul.f32 %v501_v62, %v389_v29  ;;  %v508_v20 = vmul.f32 %v500_v63, %v388_v37  ;;  %v504_v26 = vsub.f32 0.0, %v392_v46 }
  0xe7   : > { %797 = vrcp.f32 %v402_v60  ;;  %v498_v27 = vsub.f32 0.0, %v386_v49  ;;  %vm369_vm1 = vcmp.lt.f32.partialorder %v897_v17, 0.0  ;;  %vm372_vm3 = vcmp.lt.f32.partialorder %v910_v34, 0.0 }
  0xe8   : > { %799 = vpow2.f32 %v517_v1  ;;  %v406_v30 = vadd.f32 1.0, %v398_v9  ;;  %v521_v35 = vmul.f32 1.442695, %v509_v19  ;;  %v519_v39 = vmul.f32 1.442695, %v508_v20 }
  0xe9   : > { %801 = vpow2.f32 %v513_v7  ;;  %v512_v48 = vmul.f32 %v504_v26, %v392_v46  ;;  %v506_v50 = vmul.f32 %v498_v27, %v386_v49  ;;  %vm373_vm4 = vcmp.lt.f32.partialorder %v904_v25, 0.0 }
  0xea   : > { %803 = vrcp.f32 %v406_v30  ;;  %vm370_vm6 = vcmp.lt.f32.partialorder %v921_v43, 0.0  ;;  %v359_v34 = vmul.f32 0.5, %v885_v10  ;;  %vm376_vm7 = vcmp.lt.f32.partialorder %v918_v41, 0.0 }
  0xeb   : > { %805 = vpow2.f32 %v525_v16  ;;  %v527_v63 = vmul.f32 1.442695, %v512_v48  ;;  %vm374_vm8 = vcmp.lt.f32.partialorder %v928_v53, 0.0 }
  0xec   : > { %v930_v54 = vpop.eup %785  ;;  %807 = vpow2.f32 %v521_v35 }
  0xed   : > { %v932_v56 = vpop.eup %787  ;;  %v427_v57 = vmul.f32 1.0614054, %v930_v54  ;;  %809 = vpow2.f32 %v519_v39 }
  0xee   : > { %v431_v61 = vmul.f32 1.0614054, %v932_v56  ;;  %v939_v3 = vpop.eup %789  ;;  %811 = vpow2.f32 %v527_v63 }
  0xef   : > { %v435_v0 = vadd.f32 -1.4531521, %v427_v57  ;;  %v425_v6 = vmul.f32 1.0614054, %v939_v3  ;;  %v944_v11 = vpop.eup %791 }
  0xf0   : > { %v439_v4 = vadd.f32 -1.4531521, %v431_v61  ;;  %v429_v23 = vmul.f32 1.0614054, %v944_v11 }
  0xf1   : > { %v443_v5 = vmul.f32 %v930_v54, %v435_v0  ;;  %v433_v22 = vadd.f32 -1.4531521, %v425_v6  ;;  %v950_v29 = vpop.eup %793  ;;  %v515_v0 = vmul.f32 1.442695, %v506_v50 }
  0xf2   : > { %v447_v14 = vmul.f32 %v932_v56, %v439_v4  ;;  %v437_v33 = vadd.f32 -1.4531521, %v429_v23  ;;  %v428_v47 = vmul.f32 1.0614054, %v950_v29  ;;  %v957_v58 = vpop.eup %795 }
  0xf3   : > { %v451_v21 = vadd.f32 1.4214138, %v443_v5  ;;  %v441_v32 = vmul.f32 %v939_v3, %v433_v22  ;;  %v432_v49 = vmul.f32 1.0614054, %v957_v58  ;;  %813 = vpow2.f32 %v515_v0 }
  0xf4   : > { %v455_v24 = vadd.f32 1.4214138, %v447_v14  ;;  %v445_v45 = vmul.f32 %v944_v11, %v437_v33  ;;  %v436_v57 = vadd.f32 -1.4531521, %v428_v47  ;;  %v960_v62 = vpop.eup %797  ;;  %v502_v14 = vsub.f32 0.0, %v937_v2 }
  0xf5   : > { %v459_v31 = vmul.f32 %v930_v54, %v451_v21  ;;  %v449_v42 = vadd.f32 1.4214138, %v441_v32  ;;  %v426_v6 = vmul.f32 1.0614054, %v960_v62  ;;  %v440_v9 = vadd.f32 -1.4531521, %v432_v49  ;;  %v800_v22 = vpop.eup %799 }
  0xf6   : > { %v463_v40 = vmul.f32 %v932_v56, %v455_v24  ;;  %v453_v55 = vadd.f32 1.4214138, %v445_v45  ;;  %v444_v46 = vmul.f32 %v950_v29, %v436_v57  ;;  %v802_v32 = vpop.eup %801  ;;  %v510_v45 = vmul.f32 %v502_v14, %v937_v2 }
  0xf7   : > { %v467_v37 = vadd.f32 -0.28449672, %v459_v31  ;;  %v457_v52 = vmul.f32 %v939_v3, %v449_v42  ;;  %v434_v21 = vadd.f32 -1.4531521, %v426_v6  ;;  %v448_v24 = vmul.f32 %v957_v58, %v440_v9  ;;  %v974_v39 = vpop.eup %803 }
  0xf8   : > { %v471_v59 = vadd.f32 -0.28449672, %v463_v40  ;;  %v461_v61 = vmul.f32 %v944_v11, %v453_v55  ;;  %v452_v7 = vadd.f32 1.4214138, %v444_v46  ;;  %v523_v46 = vmul.f32 1.442695, %v510_v45 }
  0xf9   : > { %v475_v51 = vmul.f32 %v930_v54, %v467_v37  ;;  %v465_v60 = vadd.f32 -0.28449672, %v457_v52  ;;  %v442_v31 = vmul.f32 %v960_v62, %v434_v21  ;;  %v456_v35 = vadd.f32 1.4214138, %v448_v24  ;;  %v806_v52 = vpop.eup %805 }
  0xfa   : > { %v469_v5 = vadd.f32 -0.28449672, %v461_v61  ;;  %v479_v16 = vmul.f32 %v932_v56, %v471_v59  ;;  %v460_v23 = vmul.f32 %v950_v29, %v452_v7  ;;  %v808_v59 = vpop.eup %807  ;;  %815 = vpow2.f32 %v523_v46 }
  0xfb   : > { %v483_v1 = vadd.f32 0.2548296, %v475_v51  ;;  %v473_v4 = vmul.f32 %v939_v3, %v465_v60  ;;  %v450_v42 = vadd.f32 1.4214138, %v442_v31  ;;  %v810_v49 = vpop.eup %809  ;;  %v354_v46 = vmul.f32 0.5, %v915_v38 }
  0xfc   : > { %v477_v20 = vmul.f32 %v944_v11, %v469_v5  ;;  %v468_v33 = vadd.f32 -0.28449672, %v460_v23  ;;  %v487_v37 = vadd.f32 0.2548296, %v479_v16  ;;  %v812_v21 = vpop.eup %811 }
  0xfd   : > { %v481_v19 = vadd.f32 0.2548296, %v473_v4  ;;  %v491_v26 = vmul.f32 %v930_v54, %v483_v1  ;;  %v464_v54 = vmul.f32 %v957_v58, %v456_v35  ;;  %v458_v51 = vmul.f32 %v960_v62, %v450_v42 }
  0xfe   : > { %v485_v30 = vadd.f32 0.2548296, %v477_v20  ;;  %v476_v47 = vmul.f32 %v950_v29, %v468_v33  ;;  %v495_v60 = vmul.f32 %v932_v56, %v487_v37  ;;  %v825_v4 = vmov 1.0  }
  0xff   : > { %v489_v27 = vmul.f32 %v939_v3, %v481_v19  ;;  %v430_v3 = vmul.f32 1.0614054, %v974_v39  ;;  %v531_v48 = vmul.f32 %v800_v22, %v491_v26  ;;  %v472_v57 = vadd.f32 -0.28449672, %v464_v54 }
 0x100   : > { %v493_v50 = vmul.f32 %v944_v11, %v485_v30  ;;  %v484_v55 = vadd.f32 0.2548296, %v476_v47  ;;  %v466_v61 = vadd.f32 -0.28449672, %v458_v51  ;;  %v377_v17 = vsel %vm369_vm1, -1.0, %v825_v4  ;;  %v814_v31 = vpop.eup %813 }
 0x101   : > { %v529_v40 = vmul.f32 %v802_v32, %v489_v27  ;;  %v480_v11 = vmul.f32 %v957_v58, %v472_v57  ;;  %v438_v0 = vadd.f32 -1.4531521, %v430_v3  ;;  %v539_v1 = vsub.f32 1.0, %v531_v48 }
 0x102   : > { %v492_v63 = vmul.f32 %v950_v29, %v484_v55  ;;  %v533_v5 = vmul.f32 %v808_v59, %v493_v50  ;;  %v474_v56 = vmul.f32 %v960_v62, %v466_v61  ;;  %v379_v14 = vsel %vm371_vm2, -1.0, %v825_v4  ;;  %v569_v50 = vld [vmem:[%s1099_s3] sm:$0xff] }
 0x103   : > { %v537_v2 = vsub.f32 1.0, %v529_v40  ;;  %v488_v7 = vadd.f32 0.2548296, %v480_v11  ;;  %v446_v9 = vmul.f32 %v974_v39, %v438_v0  ;;  %v535_v16 = vmul.f32 %v806_v52, %v495_v60  ;;  %v570_v0 = vld [vmem:[%s1099_s3 + $0x8] sm:$0xff] }
 0x104   : > { %v532_v6 = vmul.f32 %v810_v49, %v492_v63  ;;  %v482_v19 = vadd.f32 0.2548296, %v474_v56  ;;  %v355_v22 = vmul.f32 0.5, %v883_v8  ;;  %v547_v23 = vmul.f32 %v539_v1, %v379_v14  ;;  %v734_v1 = vld [vmem:[%s1099_s3 + $0x48] sm:$0xff]  ;;  %v572_v14 = vld [vmem:[%s1099_s3 + $0x18] sm:$0xff] }
 0x105   : > { %v545_v12 = vmul.f32 %v537_v2, %v377_v17  ;;  %v454_v20 = vadd.f32 1.4214138, %v446_v9  ;;  %v496_v24 = vmul.f32 %v957_v58, %v488_v7  ;;  %v541_v26 = vsub.f32 1.0, %v533_v5  ;;  %v571_v2 = vld [vmem:[%s1099_s3 + $0x10] sm:$0xff] }
 0x106   : > { %v540_v29 = vsub.f32 1.0, %v532_v6  ;;  %v490_v27 = vmul.f32 %v960_v62, %v482_v19  ;;  %v543_v32 = vsub.f32 1.0, %v535_v16  ;;  %v380_v35 = vsel %vm372_vm3, -1.0, %v825_v4  ;;  %v736_v16 = vld [vmem:[%s1099_s3 + $0x58] sm:$0xff] }
 0x107   : > { %v462_v30 = vmul.f32 %v974_v39, %v454_v20  ;;  %v553_v33 = vadd.f32 1.0, %v545_v12  ;;  %v555_v25 = vadd.f32 1.0, %v547_v23  ;;  %v353_v40 = vmul.f32 0.5, %v890_v13  ;;  %v733_v13 = vld [vmem:[%s1099_s3 + $0x40] sm:$0xff]  ;;  %v816_v17 = vpop.eup %815 }
 0x108   : > { %v548_v8 = vmul.f32 %v540_v29, %v380_v35  ;;  %v530_v58 = vmul.f32 %v814_v31, %v490_v27  ;;  %v381_v62 = vsel %vm373_vm4, -1.0, %v825_v4  ;;  %v536_v42 = vmul.f32 %v812_v21, %v496_v24  ;;  %v573_v24 = vld [vmem:[%s1099_s3 + $0x20] sm:$0xff] }
 0x109   : > { %v470_v37 = vadd.f32 -0.28449672, %v462_v30  ;;  %v383_v45 = vsel %vm375_vm5, -1.0, %v825_v4  ;;  %v549_v15 = vmul.f32 %v541_v26, %v381_v62  ;;  %v561_v48 = vmul.f32 %v553_v33, %v353_v40  ;;  %v737_v26 = vld [vmem:[%s1099_s3 + $0x60] sm:$0xff] }
 0x10a   : > { %v538_v47 = vsub.f32 1.0, %v530_v58  ;;  %v551_v3 = vmul.f32 %v543_v32, %v383_v45  ;;  %v378_v43 = vsel %vm370_vm6, -1.0, %v825_v4  ;;  %v357_v51 = vmul.f32 0.5, %v899_v18  ;;  %v735_v18 = vld [vmem:[%s1099_s3 + $0x50] sm:$0xff] }
 0x10b   : > { %v478_v54 = vmul.f32 %v974_v39, %v470_v37  ;;  %v356_v52 = vmul.f32 0.5, %v906_v28  ;;  %v556_v55 = vadd.f32 1.0, %v548_v8  ;;  %v563_v59 = vmul.f32 %v555_v25, %v355_v22  ;;  %v575_v45 = vld [vmem:[%s1099_s3 + $0x30] sm:$0xff] }
 0x10c   : > { %v546_v57 = vmul.f32 %v538_v47, %v378_v43  ;;  %v544_v10 = vsub.f32 1.0, %v536_v42  ;;  %v557_v61 = vadd.f32 1.0, %v549_v15  ;;  %v559_v28 = vadd.f32 1.0, %v551_v3  ;;  %v574_v3 = vld [vmem:[%s1099_s3 + $0x28] sm:$0xff] }
 0x10d   : > { %v486_v60 = vadd.f32 0.2548296, %v478_v54  ;;  %v577_v63 = vmul.f32 %v569_v50, %v561_v48  ;;  %v618_v11 = vmul.f32 %v733_v13, %v561_v48  ;;  %v564_v5 = vmul.f32 %v556_v55, %v356_v52  ;;  %v738_v48 = vld [vmem:[%s1099_s3 + $0x68] sm:$0xff] }
 0x10e   : > { %v554_v49 = vadd.f32 1.0, %v546_v57  ;;  %v360_v6 = vmul.f32 0.5, %v912_v36  ;;  %v384_v7 = vsel %vm376_vm7, -1.0, %v825_v4  ;;  %v579_v9 = vmul.f32 %v571_v2, %v563_v59  ;;  %v739_v57 = vld [vmem:[%s1099_s3 + $0x70] sm:$0xff] }
 0x10f   : > { %v494_v38 = vmul.f32 %v974_v39, %v486_v60  ;;  %v552_v12 = vmul.f32 %v544_v10, %v384_v7  ;;  %v382_v39 = vsel %vm374_vm8, -1.0, %v825_v4  ;;  %v620_v29 = vmul.f32 %v735_v18, %v563_v59 }
 0x110   : > { %v562_v56 = vmul.f32 %v554_v49, %v354_v46  ;;  %v565_v19 = vmul.f32 %v557_v61, %v357_v51  ;;  %v567_v21 = vmul.f32 %v559_v28, %v359_v34  ;;  %v585_v22 = vsel %vm275_vm0, %v577_v63, 0.0  ;;  %v576_v51 = vld [vmem:[%s1099_s3 + $0x38] sm:$0xff] }
 0x111   : > { %v534_v36 = vmul.f32 %v816_v17, %v494_v38  ;;  %v626_v23 = vsel %vm275_vm0, %v618_v11, 0.0  ;;  %v580_v4 = vmul.f32 %v572_v14, %v564_v5  ;;  %v621_v27 = vmul.f32 %v736_v16, %v564_v5  ;;  %v740_v11 = vld [vmem:[%s1099_s3 + $0x78] sm:$0xff] }
 0x112   : > { %v578_v41 = vmul.f32 %v570_v0, %v562_v56  ;;  %v619_v20 = vmul.f32 %v734_v1, %v562_v56  ;;  %v560_v32 = vadd.f32 1.0, %v552_v12  ;;  %v588_v58 = vsel %vm275_vm0, %v579_v9, 0.0 }
 0x113   : > { %v542_v53 = vsub.f32 1.0, %v534_v36  ;;  %v629_v37 = vsel %vm275_vm0, %v620_v29, 0.0  ;;  %v581_v25 = vmul.f32 %v573_v24, %v565_v19  ;;  %v622_v40 = vmul.f32 %v737_v26, %v565_v19 }
 0x114   : > { %v586_v30 = vsel %vm275_vm0, %v578_v41, 0.0  ;;  %v627_v31 = vsel %vm275_vm0, %v619_v20, 0.0  ;;  %v358_v62 = vmul.f32 0.5, %v923_v44  ;;  %v590_v54 = vsel %vm275_vm0, %v580_v4, 0.0 }
 0x115   : > { %v587_v33 = vadd.f32 %v586_v30, %v585_v22  ;;  %v628_v35 = vadd.f32 %v627_v31, %v626_v23  ;;  %v550_v8 = vmul.f32 %v542_v53, %v382_v39  ;;  %v631_v34 = vsel %vm275_vm0, %v621_v27, 0.0  ;;  %v658_v31 = vld [vmem:[%s1100_s4] sm:$0xff] }
 0x116   : > { %v568_v44 = vmul.f32 %v560_v32, %v360_v6  ;;  %v583_v52 = vmul.f32 %v575_v45, %v567_v21  ;;  %v592_v55 = vsel %vm275_vm0, %v581_v25, 0.0  ;;  %v633_v59 = vsel %vm275_vm0, %v622_v40, 0.0 }
 0x117   : > { %v558_v42 = vadd.f32 1.0, %v550_v8  ;;  %v589_v15 = vadd.f32 %v588_v58, %v587_v33  ;;  %v630_v47 = vadd.f32 %v629_v37, %v628_v35  ;;  %v624_v18 = vmul.f32 %v739_v57, %v567_v21 }
 0x118   : > { %v584_v46 = vmul.f32 %v576_v51, %v568_v44  ;;  %v596_v1 = vsel %vm275_vm0, %v583_v52, 0.0  ;;  %v625_v5 = vmul.f32 %v740_v11, %v568_v44  ;;  %v650_v4 = vlaneseq }
 0x119   : > { %v566_v43 = vmul.f32 %v558_v42, %v358_v62  ;;  %v591_v50 = vadd.f32 %v590_v54, %v589_v15  ;;  %v632_v13 = vadd.f32 %v631_v34, %v630_v47  ;;  %v637_v6 = vsel %vm275_vm0, %v624_v18, 0.0 }
 0x11a   : > { %v598_v17 = vsel %vm275_vm0, %v584_v46, 0.0  ;;  %v639_v9 = vsel %vm275_vm0, %v625_v5, 0.0  ;;  %v651_v27 = vand.u32 127, %v650_v4 }
 0x11b   : > { %v582_v10 = vmul.f32 %v574_v3, %v566_v43  ;;  %v623_v60 = vmul.f32 %v738_v48, %v566_v43  ;;  %v593_v2 = vadd.f32 %v592_v55, %v591_v50  ;;  %v634_v61 = vadd.f32 %v633_v59, %v632_v13 }
 0x11c   : > { %vm653_vm9 = vcmp.eq.s32.totalorder %v651_v27, 1  ;;  %vm652_vm10 = vcmp.eq.s32.totalorder %v651_v27, 0 }
 0x11d   : > { %v594_v49 = vsel %vm275_vm0, %v582_v10, 0.0  ;;  %v635_v28 = vsel %vm275_vm0, %v623_v60, 0.0 }
 0x11e   : > { %v595_v63 = vadd.f32 %v594_v49, %v593_v2  ;;  %v636_v0 = vadd.f32 %v635_v28, %v634_v61 }
 0x120   : > { %v597_v38 = vadd.f32 %v596_v1, %v595_v63  ;;  %v638_v56 = vadd.f32 %v637_v6, %v636_v0 }
 0x122   : > { %v599_v7 = vadd.f32 %v598_v17, %v597_v38  ;;  %v640_v14 = vadd.f32 %v639_v9, %v638_v56 }
 0x124   : > { %600 = vadd.xlane.f32.xlu0 %v599_v7 }
 0x128   : > { %641 = vadd.xlane.f32.xlu0 %v640_v14 }
 0x1ad   : > { %v601_v16 = vpop.xlane.xlu0 %600 }
 0x1ae   : > { %v602_v12 = vrot.slane %v601_v16, 4 }
 0x1b0   : > { %v603_v39 = vadd.f32 %v602_v12, %v601_v16 }
 0x1b1   : > { %v642_v36 = vpop.xlane.xlu0 %641 }
 0x1b2   : > { %v604_v29 = vrot.slane %v603_v39, 2  ;;  %v643_v19 = vrot.slane %v642_v36, 4 }
 0x1b4   : > { %v644_v41 = vadd.f32 %v643_v19, %v642_v36  ;;  %v605_v20 = vadd.f32 %v604_v29, %v603_v39 }
 0x1b6   : > { %v645_v21 = vrot.slane %v644_v41, 2  ;;  %v606_v22 = vrot.slane %v605_v20, 1 }
 0x1b8   : > { %v646_v23 = vadd.f32 %v645_v21, %v644_v41  ;;  %v607_v24 = vadd.f32 %v606_v22, %v605_v20 }
 0x1ba   : > { %766 = vpush %v607_v24  ;;  %v647_v26 = vrot.slane %v646_v23, 1 }
 0x1bc   : > { %v648_v53 = vadd.f32 %v647_v26, %v646_v23 }
 0x1be   : > { %768 = vpush %v648_v53 }
 0x1eb   : > { %s767_s14 = spop %766 }
 0x1ec   : > { %v656_v32 = vstv %s767_s14 }
 0x1ef   : > { %s769_s16 = spop %768 }
 0x1f0   : > { %v654_v30 = vstv %s769_s16 }
 0x1f1   : > { %v655_v33 = vsel %vm653_vm9, %v654_v30, 0.0 }
 0x1f2   : > { %v657_v35 = vsel %vm652_vm10, %v656_v32, %v655_v33 }
 0x1f3   : > { %v659_v8 = vadd.f32 %v658_v31, %v657_v35 }
 0x1f5   : > { %660 = vst [vmem:[%s222_s23] sm:$0xff] %v659_v8 }
 0x1f6 PF: > { %s15_s18 = sadd.s32 1, %s823_s18  }
 0x1f7   : > { %p12_p4 = scmp.ge.s32.totalorder %s15_s18, 4  }
 0x1f9   :  { %14 = sbr.rel (!%p12_p4) target bundleno = 1 (0x1), region = 71 }

</bundles_post_ra>
